<compile_context>
chip_gen: v7x
topology: tpu7x:2x2x1
jax: 0.10.0
libtpu: 0.0.40
codegen_flags: <defaults>
</compile_context>

<pallas_src>
import functools

import jax
import jax.numpy as jnp
from jax import lax
from jax.experimental import pallas as pl
from jax.experimental.pallas import tpu as pltpu


def _cdiv(a: int, b: int) -> int:
    return -(-a // b)


def _num_tensorcores() -> int:
    """Best-effort TensorCores per device (v7x: 2; v5e/v6e: 1). Defaults to 1."""
    try:
        n = int(getattr(jax.devices()[0], "num_cores", 1) or 1)
        return 2 if n >= 2 else 1
    except Exception:  # defensive: never let detection break the forward pass
        return 1


def prepare_bow_classifier_params(weight, bias, param_dtype=jnp.bfloat16):
    """One-time parameter prep, hoisted out of the per-call forward.

    * weight keeps its native nn.Linear (num_labels, vocab) layout; it is only cast to
      the streaming dtype (bf16 halves the HBM bytes of the dominant weight re-stream and
      is MXU-native on v5e/v6e/v7x; the kernel still accumulates in f32).
    * bias stays f32 (the log_softmax epilogue runs in f32), reshaped to (1, num_labels).
    """
    w = jnp.asarray(weight).astype(param_dtype)
    b = jnp.asarray(bias).astype(jnp.float32).reshape(1, -1)
    return w, b


def _bow_matmul_kernel(x_ref, w_ref, b_ref, o_ref, acc_ref, *,
                       vocab, block_k, kt_per_split, kt_total, num_split,
                       fuse_softmax):
    """One (split, batch-tile) strip of logits, reduced over vocab tiles.

    grid = (num_split, batch_tiles, kt_per_split); the vocab reduction is the trailing
    ("arbitrary") axis so the f32 accumulator scratch lives across it.
    """
    s = pl.program_id(0)
    k = pl.program_id(2)
    g = s * kt_per_split + k          # global vocab-tile index

    @pl.when(k == 0)
    def _init():
        acc_ref[...] = jnp.zeros_like(acc_ref)

    def _accumulate(xv, wv):
        # 'bv,lv->bl': contract the shared vocab axis of both operands directly — the
        # weight is never transposed or lane-padded. N = num_labels underfills the MXU,
        # but the kernel is HBM-bound, so bytes (not MXU fill) are what matter.
        acc_ref[...] += lax.dot_general(
            xv, wv, (((1,), (1,)), ((), ())),
            preferred_element_type=jnp.float32)

    def _full_tile():
        _accumulate(x_ref[...].astype(w_ref.dtype), w_ref[...])

    ragged = (vocab % block_k) != 0                           # static
    has_empty_tiles = num_split * kt_per_split > kt_total     # static

    if ragged:
        def _ragged_tile():
            # Last global vocab tile: data past `vocab` is unspecified (possibly
            # NaN/Inf), so mask BOTH operands — masked products are exactly zero.
            rem = vocab - g * block_k
            x_ok = lax.broadcasted_iota(jnp.int32, x_ref.shape, 1) < rem
            w_ok = lax.broadcasted_iota(jnp.int32, w_ref.shape, 1) < rem
            xv = jnp.where(x_ok, x_ref[...], 0).astype(w_ref.dtype)
            wv = jnp.where(w_ok, w_ref[...], 0)
            _accumulate(xv, wv)

        @pl.when(g == kt_total - 1)
        def _():
            _ragged_tile()

        @pl.when(g < kt_total - 1)
        def _():
            _full_tile()
    elif has_empty_tiles:
        @pl.when(g < kt_total)
        def _():
            _full_tile()
    else:
        _full_tile()

    @pl.when(k == kt_per_split - 1)
    def _finalize():
        if fuse_softmax:
            # num_split == 1: finish bias + log_softmax in-kernel, all in f32.
            logits = acc_ref[...] + b_ref[...]
            m = jnp.max(logits, axis=-1, keepdims=True)
            shifted = logits - m
            lse = jnp.log(jnp.sum(jnp.exp(shifted), axis=-1, keepdims=True))
            o_ref[...] = (shifted - lse).astype(o_ref.dtype)
        else:
            # Split-K: emit this split's partial f32 logits; the tiny combine kernel
            # adds the splits, the bias and the log_softmax.
            o_ref[...] = acc_ref[...].astype(o_ref.dtype)


def _bow_combine_kernel(p_ref, b_ref, o_ref):
    # p_ref: (num_split, batch, L) f32 partial logits (tiny: batch <= block_m).
    logits = jnp.sum(p_ref[...], axis=0) + b_ref[...]
    m = jnp.max(logits, axis=-1, keepdims=True)
    shifted = logits - m
    lse = jnp.log(jnp.sum(jnp.exp(shifted), axis=-1, keepdims=True))
    o_ref[...] = (shifted - lse).astype(o_ref.dtype)


def bow_classifier_forward(bow_vec, weight, bias, *, block_m=512, block_k=None,
                           num_split_k=None):
    """log_softmax(bow_vec @ weight.T + bias, axis=1) via Pallas TPU kernels.

    `weight`/`bias` should come from prepare_bow_classifier_params() (done once at model
    setup so the dtype cast is not re-paid on every call); raw nn.Linear parameters also
    work. Output is f32.
    """
    batch, vocab = bow_vec.shape
    num_labels = weight.shape[0]
    assert weight.shape == (num_labels, vocab)
    if bias.ndim == 1:
        bias = bias.reshape(1, -1)
    bias = bias.astype(jnp.float32)

    # ---- tile sizes ----------------------------------------------------------------
    # Batch tile: large (512) so the full weight is re-streamed once per 512 batch rows
    # rather than per 128. Batch is never padded; a ragged last batch tile only produces
    # out-of-bounds rows, which Pallas drops on writeback.
    tm = batch if batch <= block_m else block_m

    # Vocab tile: big K tiles amortise the ~0.35us/grid-step cost. 4096 for 16-bit x,
    # 2048 for f32 x keeps the double-buffered working set ~8.5 MiB (fits v5e's 16 MiB
    # scoped VMEM; v7x's scoped default is 32 of 64 MiB).
    if block_k is None:
        block_k = 4096 if bow_vec.dtype.itemsize <= 2 else 2048
    block_k = max(128, (block_k // 128) * 128)
    tk = vocab if vocab <= block_k else block_k

    def _working_set_bytes(tk_):
        return (2 * tm * tk_ * bow_vec.dtype.itemsize            # x double-buffer
                + 2 * num_labels * tk_ * weight.dtype.itemsize   # w double-buffer
                + tm * 128 * 4)                                   # f32 accumulator (lane-padded)
    while vocab > tk > 128 and _working_set_bytes(tk) > (12 << 20):
        tk //= 2

    kt_total = _cdiv(vocab, tk)
    n_bt = _cdiv(batch, tm)

    # ---- split-K across TensorCores (v7x) -------------------------------------------
    # With a single batch tile the "parallel" batch axis has extent 1 and v7x's second
    # TensorCore would idle; split the vocab reduction into independent partial sums
    # instead. On 1-TC chips the extra axis runs sequentially (same total work).
    if num_split_k is None:
        num_split_k = _num_tensorcores() if (n_bt == 1 and kt_total >= 4) else 1
    n_split = max(1, min(int(num_split_k), kt_total))
    if n_bt > 1:
        n_split = 1   # multiple batch tiles already give the second core work
    kt_per_split = _cdiv(kt_total, n_split)
    fuse_softmax = n_split == 1

    last_g = kt_total - 1
    if n_split * kt_per_split > kt_total:
        # Odd tile count: clamp the (skipped-in-kernel) trailing tiles of the last split
        # onto a valid block so the automatic DMA stays in bounds.
        def _g(s, k):
            return jnp.minimum(s * kt_per_split + k, last_g)
    else:
        def _g(s, k):
            return s * kt_per_split + k

    x_spec = pl.BlockSpec((tm, tk), lambda s, i, k: (i, _g(s, k)))
    w_spec = pl.BlockSpec((num_labels, tk), lambda s, i, k: (0, _g(s, k)))
    b_spec = pl.BlockSpec((1, num_labels), lambda s, i, k: (0, 0))

    if fuse_softmax:
        out_shape = jax.ShapeDtypeStruct((batch, num_labels), jnp.float32)
        out_spec = pl.BlockSpec((tm, num_labels), lambda s, i, k: (i, 0))
    else:
        out_shape = jax.ShapeDtypeStruct((n_split, batch, num_labels), jnp.float32)
        out_spec = pl.BlockSpec((None, tm, num_labels), lambda s, i, k: (s, i, 0))

    kernel = functools.partial(
        _bow_matmul_kernel, vocab=vocab, block_k=tk,
        kt_per_split=kt_per_split, kt_total=kt_total, num_split=n_split,
        fuse_softmax=fuse_softmax)

    result = pl.pallas_call(
        kernel,
        out_shape=out_shape,
        grid=(n_split, n_bt, kt_per_split),
        in_specs=[x_spec, w_spec, b_spec],
        out_specs=out_spec,
        scratch_shapes=[pltpu.VMEM((tm, num_labels), jnp.float32)],
        compiler_params=pltpu.CompilerParams(
            dimension_semantics=("parallel", "parallel", "arbitrary"),
            vmem_limit_bytes=32 * 1024 * 1024),
    )(bow_vec, weight, bias)

    if fuse_softmax:
        return result

    # Tiny combine epilogue (only with n_split >= 2, i.e. batch <= block_m): sum the
    # per-split partial logits, add the bias, take log_softmax — all resident in VMEM.
    return pl.pallas_call(
        _bow_combine_kernel,
        out_shape=jax.ShapeDtypeStruct((batch, num_labels), jnp.float32),
        in_specs=[pl.BlockSpec(memory_space=pltpu.MemorySpace.VMEM),
                  pl.BlockSpec(memory_space=pltpu.MemorySpace.VMEM)],
        out_specs=pl.BlockSpec(memory_space=pltpu.MemorySpace.VMEM),
    )(result, bias)


if __name__ == "__main__":
    # Module hyper-parameters (BoWClassifier(num_labels, vocab_size)) at small sizes.
    NUM_LABELS, VOCAB_SIZE, BATCH = 4, 32, 2

    key = jax.random.PRNGKey(0)
    k = list(jax.random.split(key, 9))

    # --- exact f32 check at the tutorial-sized problem -------------------------------
    bound = 1.0 / (VOCAB_SIZE ** 0.5)
    weight = jax.random.uniform(k[0], (NUM_LABELS, VOCAB_SIZE), jnp.float32,
                                minval=-bound, maxval=bound)
    bias = jax.random.uniform(k[1], (NUM_LABELS,), jnp.float32,
                              minval=-bound, maxval=bound)
    bow_vec = jax.random.randint(k[2], (BATCH, VOCAB_SIZE), 0, 3).astype(jnp.float32)

    w_p, b_p = prepare_bow_classifier_params(weight, bias, param_dtype=jnp.float32)
    out = jax.block_until_ready(bow_classifier_forward(bow_vec, w_p, b_p))
    ref = jax.nn.log_softmax(bow_vec @ weight.T + bias, axis=1)
    assert out.shape == (BATCH, NUM_LABELS)
    assert jnp.allclose(out, ref, atol=1e-5, rtol=1e-5)

    # --- tiled vocab reduction, bf16 streaming, ragged last K tile --------------------
    L2, V2, B2 = 6, 3000, 50
    bound2 = 1.0 / (V2 ** 0.5)
    w2 = jax.random.uniform(k[3], (L2, V2), jnp.float32, minval=-bound2, maxval=bound2)
    b2 = jax.random.uniform(k[4], (L2,), jnp.float32, minval=-bound2, maxval=bound2)
    x2 = jax.random.randint(k[5], (B2, V2), 0, 3).astype(jnp.bfloat16)  # counts: exact in bf16

    w2p, b2p = prepare_bow_classifier_params(w2, b2)   # bf16 weight stream
    out2 = jax.block_until_ready(
        bow_classifier_forward(x2, w2p, b2p, block_k=1024, num_split_k=1))
    ref2 = jax.nn.log_softmax(
        x2.astype(jnp.float32) @ w2p.astype(jnp.float32).T + b2, axis=1)
    assert out2.shape == (B2, L2)
    assert jnp.allclose(out2, ref2, atol=2e-3, rtol=2e-3)

    # --- split-K over vocab (v7x second-TensorCore path) + combine epilogue -----------
    L3, V3, B3 = 5, 3000, 24
    bound3 = 1.0 / (V3 ** 0.5)
    w3 = jax.random.uniform(k[6], (L3, V3), jnp.float32, minval=-bound3, maxval=bound3)
    b3 = jax.random.uniform(k[7], (L3,), jnp.float32, minval=-bound3, maxval=bound3)
    x3 = jax.random.randint(k[8], (B3, V3), 0, 3).astype(jnp.bfloat16)

    w3p, b3p = prepare_bow_classifier_params(w3, b3)
    out3 = jax.block_until_ready(
        bow_classifier_forward(x3, w3p, b3p, block_k=1024, num_split_k=2))
    ref3 = jax.nn.log_softmax(
        x3.astype(jnp.float32) @ w3p.astype(jnp.float32).T + b3, axis=1)
    assert out3.shape == (B3, L3)
    assert jnp.allclose(out3, ref3, atol=2e-3, rtol=2e-3)

    print("KERNEL_OK")
</pallas_src>

<mosaic_0001>
module attributes {stable_mosaic.version = 11 : i64} {
  func.func @_bow_matmul_kernel(%arg0: i32, %arg1: i32, %arg2: i32, %arg3: memref<2x32xf32, #tpu.memory_space<vmem>>, %arg4: memref<4x32xf32, #tpu.memory_space<vmem>>, %arg5: memref<1x4xf32, #tpu.memory_space<vmem>>, %arg6: memref<2x4xf32, #tpu.memory_space<vmem>>, %arg7: memref<2x4xf32, #tpu.memory_space<vmem>>) attributes {dimension_semantics = [#tpu.dimension_semantics<parallel>, #tpu.dimension_semantics<parallel>, #tpu.dimension_semantics<arbitrary>], iteration_bounds = array<i64: 1, 1, 1>, scalar_prefetch = 0 : i64, scratch_operands = 1 : i64, tpu.core_type = #tpu.core_type<tc>, window_params = [{transform_indices = @transform_0, window_bounds = array<i64: 2, 32>}, {transform_indices = @transform_1, window_bounds = array<i64: 4, 32>}, {pipeline_mode = #tpu.pipeline_mode<synchronous>, transform_indices = @transform_2, window_bounds = array<i64: 1, 4>}, {transform_indices = @transform_3, window_bounds = array<i64: 2, 4>}]} {
    %c0_i32 = arith.constant 0 : i32
    %0 = arith.cmpi eq, %arg2, %c0_i32 : i32
    %1 = arith.extui %0 : i1 to i32
    %c0_i32_0 = arith.constant 0 : i32
    %2 = arith.cmpi ne, %1, %c0_i32_0 : i32
    scf.if %2 {
      %cst_10 = arith.constant 0.000000e+00 : f32
      %12 = vector.broadcast %cst_10 : f32 to vector<2x4xf32>
      %c0_11 = arith.constant 0 : index
      %c0_12 = arith.constant 0 : index
      %13 = vector.load %arg7[%c0_11, %c0_12] : memref<2x4xf32, #tpu.memory_space<vmem>>, vector<2x4xf32>
      tpu.vector_store %arg7[%c0_11, %c0_12], %12 {strides = array<i32>} : memref<2x4xf32, #tpu.memory_space<vmem>>, vector<2x4xf32>,
    } else {
    }
    %c0 = arith.constant 0 : index
    %c0_1 = arith.constant 0 : index
    %3 = vector.load %arg3[%c0, %c0_1] : memref<2x32xf32, #tpu.memory_space<vmem>>, vector<2x32xf32>
    %c0_2 = arith.constant 0 : index
    %c0_3 = arith.constant 0 : index
    %4 = vector.load %arg4[%c0_2, %c0_3] : memref<4x32xf32, #tpu.memory_space<vmem>>, vector<4x32xf32>
    %c0_4 = arith.constant 0 : index
    %c0_5 = arith.constant 0 : index
    %5 = vector.load %arg7[%c0_4, %c0_5] : memref<2x4xf32, #tpu.memory_space<vmem>>, vector<2x4xf32>
    %cst = arith.constant dense<0.000000e+00> : vector<2x4xf32>
    %6 = tpu.matmul %3, %4, %cst {dimension_numbers = #tpu.dot_dimension_numbers<[1], [1], [0], [0], [0, 0, 1, 0], [], []>} : vector<2x32xf32>, vector<4x32xf32>, vector<2x4xf32> -> vector<2x4xf32>
    %7 = arith.addf %5, %6 : vector<2x4xf32>
    %c0_6 = arith.constant 0 : index
    %c0_7 = arith.constant 0 : index
    %8 = vector.load %arg7[%c0_6, %c0_7] : memref<2x4xf32, #tpu.memory_space<vmem>>, vector<2x4xf32>
    tpu.vector_store %arg7[%c0_6, %c0_7], %7 {strides = array<i32>} : memref<2x4xf32, #tpu.memory_space<vmem>>, vector<2x4xf32>,
    %c0_i32_8 = arith.constant 0 : i32
    %9 = arith.cmpi eq, %arg2, %c0_i32_8 : i32
    %10 = arith.extui %9 : i1 to i32
    %c0_i32_9 = arith.constant 0 : i32
    %11 = arith.cmpi ne, %10, %c0_i32_9 : i32
    scf.if %11 {
      %c0_10 = arith.constant 0 : index
      %c0_11 = arith.constant 0 : index
      %12 = vector.load %arg7[%c0_10, %c0_11] : memref<2x4xf32, #tpu.memory_space<vmem>>, vector<2x4xf32>
      %c0_12 = arith.constant 0 : index
      %c0_13 = arith.constant 0 : index
      %13 = vector.load %arg5[%c0_12, %c0_13] : memref<1x4xf32, #tpu.memory_space<vmem>>, vector<1x4xf32>
      %14 = vector.broadcast %13 : vector<1x4xf32> to vector<2x4xf32>
      %15 = arith.addf %12, %14 : vector<2x4xf32>
      %cst_14 = arith.constant dense<0xFF800000> : vector<2xf32>
      %16 = vector.multi_reduction <maximumf>, %15, %cst_14 [1] : vector<2x4xf32> to vector<2xf32>
      %17 = vector.shape_cast %16 : vector<2xf32> to vector<2x1xf32>
      %18 = vector.broadcast %17 : vector<2x1xf32> to vector<2x4xf32>
      %19 = arith.subf %15, %18 : vector<2x4xf32>
      %20 = math.exp %19 : vector<2x4xf32>
      %cst_15 = arith.constant dense<0.000000e+00> : vector<2xf32>
      %21 = vector.multi_reduction <add>, %20, %cst_15 [1] : vector<2x4xf32> to vector<2xf32>
      %22 = vector.shape_cast %21 : vector<2xf32> to vector<2x1xf32>
      %23 = math.log %22 : vector<2x1xf32>
      %24 = vector.broadcast %23 : vector<2x1xf32> to vector<2x4xf32>
      %25 = arith.subf %19, %24 : vector<2x4xf32>
      %c0_16 = arith.constant 0 : index
      %c0_17 = arith.constant 0 : index
      %26 = vector.load %arg6[%c0_16, %c0_17] : memref<2x4xf32, #tpu.memory_space<vmem>>, vector<2x4xf32>
      tpu.vector_store %arg6[%c0_16, %c0_17], %25 {strides = array<i32>} : memref<2x4xf32, #tpu.memory_space<vmem>>, vector<2x4xf32>,
    } else {
    }
    return
  }
  func.func @transform_0(%arg0: i32, %arg1: i32, %arg2: i32) -> (i32, i32) {
    %c1_i32 = arith.constant 1 : i32
    %0 = arith.muli %arg0, %c1_i32 : i32
    %1 = arith.addi %0, %arg2 : i32
    %c0_i32 = arith.constant 0 : i32
    return %arg1, %1 : i32, i32
  }
  func.func @transform_1(%arg0: i32, %arg1: i32, %arg2: i32) -> (i32, i32) {
    %c1_i32 = arith.constant 1 : i32
    %0 = arith.muli %arg0, %c1_i32 : i32
    %1 = arith.addi %0, %arg2 : i32
    %c0_i32 = arith.constant 0 : i32
    %c0_i32_0 = arith.constant 0 : i32
    return %c0_i32, %1 : i32, i32
  }
  func.func @transform_2(%arg0: i32, %arg1: i32, %arg2: i32) -> (i32, i32) {
    %c0_i32 = arith.constant 0 : i32
    %c0_i32_0 = arith.constant 0 : i32
    %c0_i32_1 = arith.constant 0 : i32
    return %c0_i32, %c0_i32_0 : i32, i32
  }
  func.func @transform_3(%arg0: i32, %arg1: i32, %arg2: i32) -> (i32, i32) {
    %c0_i32 = arith.constant 0 : i32
    %c0_i32_0 = arith.constant 0 : i32
    return %arg1, %c0_i32 : i32, i32
  }
}

</mosaic_0001>

<bundles_post_ra>
// kernel: tpu_custom_call.1
= control target key start
LH: loop header
LB: loop body
LE: loop exit
PB: predicated region body
PF: predicated region fallthrough
CT: control target
= control target key end

     0   :  { %8 = vsyncpa [#allocation4], 0  ;;  %s337_s0 = inlined_call_operand.hbm [shape: f32[2,32], index: 0, kind: input, shape index: {}]   ;;  %s338_s1 = inlined_call_operand.hbm [shape: f32[4,32], index: 1, kind: input, shape index: {}]   ;;  %s339_s2 = inlined_call_operand.vmem [shape: f32[1,4], index: 2, kind: input, shape index: {}]   ;;  %s340_s3 = inlined_call_operand.hbm [shape: f32[2,4], index: 3, kind: output, shape index: {}]  }
   0x1   :  { %9 = vsyncpa [#allocation7], 0 }
   0x2   :  { %10 = vsyncpa [#allocation5], 0  ;;  %s268_s12 = smov [#allocation3]   ;;  %s269_s14 = smov [#allocation6]  }
   0x3   :  { %s20_s13 = sshll.u32 %s268_s12, 4  ;;  %s33_s15 = sshll.u32 %s269_s14, 4  ;;  %s21_s13 = int_to_ptr.vmem [resolvable:$true] %s20_s13  ;;  %s34_s15 = int_to_ptr.vmem [resolvable:$true] %s33_s15 }
   0x4   :  { %s196_s18 = scalar_lea.hbm %s337_s0, 32 }
   0x5   :  { %p197_p0 = scmp.ne.s32.totalorder %s337_s0, %s196_s18  ;;  %p200_p1 = scmp.lt.u32.totalorder %s196_s18, %s337_s0 }
   0x7   :  { %p202_p2 = pnand %p200_p1, %p197_p0 }
   0x9   :  { %205 = shalt.err (!%p202_p2)
}
   0xa   :  { %s206_s23 = scalar_lea.vmem %s21_s13, 32  ;;  %p211_p4 = scmp.lt.s32.totalorder %s21_s13, %s21_s13 }
   0xb   :  { %p207_p3 = scmp.ne.s32.totalorder %s21_s13, %s206_s23  ;;  %p212_p5 = scmp.lt.s32.totalorder %s206_s23, %s206_s23 }
   0xd   :  { %p213_p6 = por %p212_p5, %p211_p4 }
   0xf   :  { %p214_p7 = pnand %p213_p6, %p207_p3 }
  0x11   :  { %217 = shalt.err (!%p214_p7)
}
  0x12   :  { %23 = dma.hbm_to_vmem [thread:$0]  %s337_s0, 32, %s21_s13, [#allocation4]  }
  0x13   :  { %s218_s28 = scalar_lea.hbm %s338_s1, 64 }
  0x14   :  { %p219_p8 = scmp.ne.s32.totalorder %s338_s1, %s218_s28  ;;  %p222_p9 = scmp.lt.u32.totalorder %s218_s28, %s338_s1 }
  0x16   :  { %p224_p10 = pnand %p222_p9, %p219_p8 }
  0x18   :  { %227 = shalt.err (!%p224_p10)
}
  0x19   :  { %s228_s6 = scalar_lea.vmem %s34_s15, 64  ;;  %p233_p12 = scmp.lt.s32.totalorder %s34_s15, %s34_s15 }
  0x1a   :  { %p229_p11 = scmp.ne.s32.totalorder %s34_s15, %s228_s6  ;;  %p234_p13 = scmp.lt.s32.totalorder %s228_s6, %s228_s6 }
  0x1c   :  { %p235_p0 = por %p234_p13, %p233_p12 }
  0x1e   :  { %p236_p1 = pnand %p235_p0, %p229_p11 }
  0x20   :  { %239 = shalt.err (!%p236_p1)
}
  0x21   :  { %36 = dma.hbm_to_vmem [thread:$0]  %s338_s1, 64, %s34_s15, [#allocation7]  }
  0x22   :  { %262 = dma.done.wait [#allocation4], 32  }
  0x23   :  { %263 = vsyncadd [#allocation4], 4294967264 }
  0x24   :  { %264 = dma.done.wait [#allocation7], 64  }
  0x25   :  { %265 = vsyncadd [#allocation7], 4294967232  ;;  %vm51_vm0 = vcmask 25600   ;;  %v270_v0 = vmov 0.0   ;;  %vm271_vm1 = vmmov 0   ;;  %vm56_vm2 = vcmask 261120  }
  0x26   :  { %52 = vst.msk [vmem:[#allocation2] sm:$0x3] %vm51_vm0, %v270_v0  ;;  %182 = vmatprep.subr.mxu0 %v270_v0  ;;  %184 = vmatprep.mubr.msk.f32.mxu0 %vm271_vm1, %v270_v0  ;;  %v54_v1 = vld [vmem:[#allocation6] sm:$0xf]  ;;  %v53_v2 = vld [vmem:[#allocation3] sm:$0x3] }
  0x27   :  { %183 = vmatpush3.xpose.msk.msra.mxu0 %vm56_vm2, %v54_v1  ;;  %v179_v7 = vld [vmem:[%s339_s2] ss:$0 sm:$0xff]  ;;  %s272_s9 = smov [#allocation8]  }
  0x28   :  { %s167_s10 = sshll.u32 %s272_s9, 4  ;;  %s168_s10 = int_to_ptr.vmem [resolvable:$true] %s167_s10 }
  0x29   :  { %s240_s2 = scalar_lea.vmem %s168_s10, 32  ;;  %p245_p3 = scmp.lt.s32.totalorder %s168_s10, %s168_s10 }
  0x2a   :  { %185 = vmatmul.mubr.msk.f32.vlgmr.msra.gmra.mrb[0].mxu0 %vm56_vm2, %v53_v2  ;;  %p241_p2 = scmp.ne.s32.totalorder %s168_s10, %s240_s2  ;;  %p246_p4 = scmp.lt.s32.totalorder %s240_s2, %s240_s2 }
  0x2c   :  { %p247_p5 = por %p246_p4, %p245_p3 }
  0x2d   :  { %v55_v3 = vld [vmem:[#allocation2] sm:$0x3] }
  0x2e   :  { %p248_p6 = pnand %p247_p5, %p241_p2 }
  0xfd   :  { %v129_v4 = vpop.f32.mrb[0].mxu0 }
  0xfe   :  { %v133_v5 = vadd.f32 %v129_v4, %v55_v3  ;;  %v186_v6 = vpop.f32.mrb[1].mxu0 }
 0x100   :  { %135 = vst.msk [vmem:[#allocation2] sm:$0x3] %vm51_vm0, %v133_v5 }
 0x107   :  { %v139_v8 = vld [vmem:[#allocation2] sm:$0x3] }
 0x108   :  { %v147_v9 = vadd.f32 %v179_v7, %v139_v8 }
 0x10a   :  { %v148_v10 = vsel %vm51_vm0, %v147_v9, -inf }
 0x10b   :  { %149 = vmax.xlane.f32.xlu0 %v148_v10 }
 0x198   :  { %v150_v11 = vpop.xlane.xlu0 %149 }
 0x199   :  { %v151_v12 = vsub.f32 %v147_v9, %v150_v11 }
 0x19b   :  { %v152_v13 = vmul.f32 1.442695, %v151_v12 }
 0x19d   :  { %192 = vpow2.f32 %v152_v13 }
 0x1a7   :  { %v193_v14 = vpop.eup %192 }
 0x1a8   :  { %v154_v15 = vsel %vm51_vm0, %v193_v14, 0.0 }
 0x1a9   :  { %155 = vadd.xlane.f32.xlu0 %v154_v15 }
 0x236   :  { %v156_v16 = vpop.xlane.xlu0 %155 }
 0x237   :  { %194 = vlog2.f32 %v156_v16 }
 0x241   :  { %v195_v17 = vpop.eup %194 }
 0x242   :  { %v158_v18 = vmul.f32 0.6931472, %v195_v17 }
 0x244   :  { %v159_v19 = vsub.f32 %v151_v12, %v158_v18 }
 0x246   :  { %160 = vst.msk [vmem:[#allocation8] sm:$0x3] %vm51_vm0, %v159_v19 }
 0x247   :  { %251 = shalt.err (!%p248_p6)
}
 0x248   :  { %s252_s13 = scalar_lea.hbm %s340_s3, 32 }
 0x249   :  { %p253_p7 = scmp.ne.s32.totalorder %s340_s3, %s252_s13  ;;  %p256_p8 = scmp.lt.u32.totalorder %s252_s13, %s340_s3 }
 0x24b   :  { %p258_p9 = pnand %p256_p8, %p253_p7 }
 0x24d   :  { %261 = shalt.err (!%p258_p9)
}
 0x24e   :  { %170 = dma.vmem_to_hbm [thread:$0]  %s168_s10, 32, %s340_s3, [#allocation5]  }
 0x24f   :  { %266 = dma.done.wait [#allocation5], 32  }
 0x250   :  { %267 = vsyncadd [#allocation5], 4294967264 }
 0x251   :  { %174 = vsyncpa [#allocation4], 1 }
 0x252   :  { %175 = vsyncpa [#allocation7], 1 }
 0x253   :  { %176 = vsyncpa [#allocation5], 1 }

</bundles_post_ra>
